<compile_context>
chip_gen: v7x
topology: tpu7x:2x2x1
jax: 0.10.0
libtpu: 0.0.40
codegen_flags: <defaults>
</compile_context>

<pallas_src>
import functools
from typing import NamedTuple, Optional

import jax
import jax.numpy as jnp
import numpy as np
from jax.experimental import pallas as pl
from jax.experimental.pallas import tpu as pltpu


def _round_up(x: int, m: int) -> int:
    return (x + m - 1) // m * m


def _vmem_limit_bytes() -> int:
    """Generation-aware scoped-VMEM limit (<= physical VMEM, with headroom)."""
    try:
        cap = int(pltpu.get_tpu_info().vmem_capacity_bytes)
    except Exception:  # off-TPU tracing / older API: assume v7x's 64 MiB (safe floor)
        cap = 64 * 1024 * 1024
    # ~48 MiB on v7x (64 MiB per TC), ~96 MiB on v5e/v6e (128 MiB).
    return max(32 * 1024 * 1024, min(int(cap * 0.75), cap - 8 * 1024 * 1024))


def _pick_tile_h(h_pad: int, k_total: int, dtype_bytes: int, vmem_limit: int) -> int:
    """Largest 128-multiple hidden tile whose double-buffered weight tiles fit."""
    weight_budget = vmem_limit // 2            # rest left for activations/outputs
    t = weight_budget // (8 * k_total * dtype_bytes)   # 2 buffers * 4 gates = 8
    t = max(128, (t // 128) * 128)
    t = min(t, h_pad)
    if h_pad >= 256:                           # >= 2 tiles -> both v7x TCs get work
        t = min(t, max(128, (h_pad // 2) // 128 * 128))
    while h_pad % t:
        t -= 128
    return t


class PackedLSTMParams(NamedTuple):
    w_x: jax.Array      # (K_in_pad, 4*H_pad) tile-major/gate-minor cols, matmul dtype
    w_h: jax.Array      # (K_h_pad,  4*H_pad) same column layout
    b: jax.Array        # (1, 4*H_pad) f32, +1.0 forget bias folded in, same layout
    input_size: int
    hidden_size: int
    h_pad: int
    tile_h: int


def pack_lstm_params(w_in, b_in, w_rec, *, matmul_dtype=jnp.float32,
                     tile_h: Optional[int] = None) -> PackedLSTMParams:
    """One-time packing of torch-layout params. Call OUTSIDE the step/scan loop.

    w_in:  (4H, input_size)  -- nn.Linear(input_size, 4H).weight
    b_in:  (4H,)             -- nn.Linear bias
    w_rec: (4H, H)           -- nn.Linear(H, 4H, bias=False).weight

    bf16 matmul_dtype is recommended on v5e, v6e and v7x (the MXU is bf16-native
    on every generation; gate math stays f32): it halves the streamed weight
    bytes, which is the binding resource at small batch.
    """
    w_in = jnp.asarray(w_in, jnp.float32)
    b_in = jnp.asarray(b_in, jnp.float32)
    w_rec = jnp.asarray(w_rec, jnp.float32)

    four_h, in_size = w_in.shape
    hidden = four_h // 4
    assert w_rec.shape == (four_h, hidden)

    dtype_bytes = jnp.dtype(matmul_dtype).itemsize
    sub = 16 if dtype_bytes == 2 else 8
    h_pad = _round_up(hidden, 128)
    k_in_pad = _round_up(in_size, sub)
    k_h_pad = _round_up(hidden, sub)

    if tile_h is None:
        tile_h = _pick_tile_h(h_pad, k_in_pad + k_h_pad, dtype_bytes,
                              _vmem_limit_bytes())
    assert tile_h % 128 == 0 and h_pad % tile_h == 0
    num_tiles = h_pad // tile_h

    def reorder(w_t, k_pad):
        # w_t: (K, 4H). Zero-pad K and H, then order the columns tile-major /
        # gate-minor so each hidden tile's 4 gate slices are contiguous,
        # lane-aligned ranges of one (K, 4*tile_h) block.
        k = w_t.shape[0]
        w_g = w_t.reshape(k, 4, hidden)                               # (K, 4, H)
        w_g = jnp.pad(w_g, ((0, k_pad - k), (0, 0), (0, h_pad - hidden)))
        w_g = w_g.reshape(k_pad, 4, num_tiles, tile_h)
        w_g = w_g.transpose(0, 2, 1, 3)                               # (K, nt, 4, th)
        return w_g.reshape(k_pad, 4 * h_pad)

    w_x = reorder(w_in.T, k_in_pad)      # pre-transposed: hot path is x @ W
    w_h = reorder(w_rec.T, k_h_pad)

    b_g = b_in.reshape(4, hidden)
    b_g = b_g.at[2].add(1.0)             # fold forget-gate +1.0 (order: i, ig, fg, og)
    b_g = jnp.pad(b_g, ((0, 0), (0, h_pad - hidden)))
    b_g = b_g.reshape(4, num_tiles, tile_h).transpose(1, 0, 2).reshape(1, 4 * h_pad)

    return PackedLSTMParams(w_x=w_x.astype(matmul_dtype),
                            w_h=w_h.astype(matmul_dtype),
                            b=b_g.astype(jnp.float32),
                            input_size=in_size, hidden_size=hidden,
                            h_pad=h_pad, tile_h=tile_h)


def _lstm_cell_kernel(x_ref, h_ref, c_ref, wx_ref, wh_ref, b_ref,
                      h_out_ref, c_out_ref, *, tile_h):
    # ONE fused 4-gate contraction per operand: (tile_b, K) @ (K, 4*tile_h),
    # f32 MXU accumulation, single broadcast bias add.
    z = (jnp.dot(x_ref[...], wx_ref[...], preferred_element_type=jnp.float32)
         + jnp.dot(h_ref[...], wh_ref[...], preferred_element_type=jnp.float32)
         + b_ref[...])                                   # (tile_b, 4*tile_h)
    c = c_ref[...].astype(jnp.float32)

    def gate(g):           # lane-aligned static slice of the fused result: free
        return z[:, g * tile_h:(g + 1) * tile_h]

    def sigmoid(v):        # sigmoid(x) = 0.5*tanh(0.5x)+0.5 -> EUP, no VPU divide
        return 0.5 * jnp.tanh(0.5 * v) + 0.5

    input_activation = jnp.tanh(gate(0))
    input_gate = sigmoid(gate(1))
    forget_gate = sigmoid(gate(2))         # +1.0 already folded into bias
    output_gate = sigmoid(gate(3))

    new_cell = c * forget_gate + input_activation * input_gate
    new_h = jnp.tanh(new_cell) * output_gate

    h_out_ref[...] = new_h.astype(h_out_ref.dtype)
    c_out_ref[...] = new_cell.astype(c_out_ref.dtype)


def lstm_cell(x, h, c, params: PackedLSTMParams):
    """One LSTMCell step. x: (B, input_size); h, c: (B, hidden). Returns (new_h, new_c)."""
    in_size, hidden = params.input_size, params.hidden_size
    b_sz = x.shape[0]
    assert x.shape == (b_sz, in_size)
    assert h.shape == (b_sz, hidden) and c.shape == (b_sz, hidden)

    mm_dtype = params.w_x.dtype
    k_in_pad = params.w_x.shape[0]
    k_h_pad = params.w_h.shape[0]
    h_pad, tile_h = params.h_pad, params.tile_h
    num_h_tiles = h_pad // tile_h

    # bf16 packs 16 rows per vreg sublane group; f32 packs 8.
    sub_b = 16 if jnp.dtype(mm_dtype).itemsize == 2 else 8
    if b_sz <= 256:
        tile_b = _round_up(b_sz, sub_b)
        b_pad = tile_b
    else:
        tile_b = 256
        b_pad = _round_up(b_sz, tile_b)
    num_b_tiles = b_pad // tile_b

    def pad2(a, rows, cols, dtype):
        a = a.astype(dtype)
        pr, pc = rows - a.shape[0], cols - a.shape[1]
        return jnp.pad(a, ((0, pr), (0, pc))) if (pr or pc) else a

    # No concatenate of [x | h]: passed separately, two accumulating dots in-kernel.
    x_p = pad2(x, b_pad, k_in_pad, mm_dtype)
    h_p = pad2(h, b_pad, k_h_pad, mm_dtype)
    c_p = pad2(c, b_pad, h_pad, c.dtype)

    out_dtype = x.dtype
    kernel = functools.partial(_lstm_cell_kernel, tile_h=tile_h)

    # Grid: hidden tiles outer (weight block reused across inner batch tiles),
    # batch tiles inner.  Both axes independent -> "parallel" (v7x 2-TC sharding).
    new_h, new_c = pl.pallas_call(
        kernel,
        out_shape=(jax.ShapeDtypeStruct((b_pad, h_pad), out_dtype),
                   jax.ShapeDtypeStruct((b_pad, h_pad), out_dtype)),
        grid=(num_h_tiles, num_b_tiles),
        in_specs=[
            pl.BlockSpec((tile_b, k_in_pad), lambda jh, jb: (jb, 0)),        # x
            pl.BlockSpec((tile_b, k_h_pad), lambda jh, jb: (jb, 0)),         # h
            pl.BlockSpec((tile_b, tile_h), lambda jh, jb: (jb, jh)),         # c tile
            pl.BlockSpec((k_in_pad, 4 * tile_h), lambda jh, jb: (0, jh)),    # w_x tile
            pl.BlockSpec((k_h_pad, 4 * tile_h), lambda jh, jb: (0, jh)),     # w_h tile
            pl.BlockSpec((1, 4 * tile_h), lambda jh, jb: (0, jh)),           # bias tile
        ],
        out_specs=(pl.BlockSpec((tile_b, tile_h), lambda jh, jb: (jb, jh)),
                   pl.BlockSpec((tile_b, tile_h), lambda jh, jb: (jb, jh))),
        compiler_params=pltpu.CompilerParams(
            dimension_semantics=("parallel", "parallel"),
            vmem_limit_bytes=_vmem_limit_bytes(),        # generation-aware cap
        ),
    )(x_p, h_p, c_p, params.w_x, params.w_h, params.b)

    if b_pad != b_sz or h_pad != hidden:
        new_h = new_h[:b_sz, :hidden]
        new_c = new_c[:b_sz, :hidden]
    return new_h, new_c


def _reference(x, h, c, w_in, b_in, w_rec, matmul_dtype=None):
    """Pure-JAX mirror of the PyTorch module's forward (optionally bf16 matmul inputs)."""
    if matmul_dtype is not None:
        cast = lambda a: a.astype(matmul_dtype).astype(jnp.float32)
        x, h, w_in, w_rec = cast(x), cast(h), cast(w_in), cast(w_rec)
    z = x @ w_in.T + b_in + h @ w_rec.T
    H = c.shape[1]
    i, ig, fg, og = (z[:, g * H:(g + 1) * H] for g in range(4))
    ia = jnp.tanh(i)
    igate = jax.nn.sigmoid(ig)
    fgate = jax.nn.sigmoid(fg + 1.0)
    ogate = jax.nn.sigmoid(og)
    new_c = c * fgate + ia * igate
    new_h = jnp.tanh(new_c) * ogate
    return new_h, new_c


def _init_params(key, input_size, hidden_size):
    """Deterministic init mirroring LSTMCell.init_weights shapes/distributions."""
    k_win, k_bin, k_wrec = jax.random.split(key, 3)
    fan_in, fan_out = input_size, 4 * hidden_size
    bound = float(np.sqrt(6.0 / (fan_in + fan_out)))
    w_in = jax.random.uniform(k_win, (4 * hidden_size, input_size),
                              minval=-bound, maxval=bound, dtype=jnp.float32)
    b_in = jax.random.uniform(k_bin, (4 * hidden_size,),
                              minval=-0.1, maxval=0.1, dtype=jnp.float32)
    w_rec = jax.nn.initializers.orthogonal()(
        k_wrec, (4 * hidden_size, hidden_size), jnp.float32)
    return w_in, b_in, w_rec


if __name__ == "__main__":
    B = 8
    INPUT_SIZE = 16
    HIDDEN = 32

    key = jax.random.PRNGKey(0)
    k_x, k_h, k_c, k_p = jax.random.split(key, 4)

    x = jax.random.normal(k_x, (B, INPUT_SIZE), dtype=jnp.float32)
    h0 = jax.random.normal(k_h, (B, HIDDEN), dtype=jnp.float32)
    c0 = jax.random.normal(k_c, (B, HIDDEN), dtype=jnp.float32)
    w_in, b_in, w_rec = _init_params(k_p, INPUT_SIZE, HIDDEN)

    # f32 path (bit-faithful to the module's math).
    packed = pack_lstm_params(w_in, b_in, w_rec)          # packed ONCE, not per call
    step = jax.jit(functools.partial(lstm_cell, params=packed))
    new_h, new_c = step(x, h0, c0)
    jax.block_until_ready((new_h, new_c))
    ref_h, ref_c = _reference(x, h0, c0, w_in, b_in, w_rec)
    np.testing.assert_allclose(np.asarray(new_h), np.asarray(ref_h), rtol=1e-4, atol=1e-4)
    np.testing.assert_allclose(np.asarray(new_c), np.asarray(ref_c), rtol=1e-4, atol=1e-4)

    # bf16 matmul path (recommended on v5e/v6e/v7x: half the weight bytes streamed).
    packed_bf16 = pack_lstm_params(w_in, b_in, w_rec, matmul_dtype=jnp.bfloat16)
    step_bf16 = jax.jit(functools.partial(lstm_cell, params=packed_bf16))
    new_h16, new_c16 = step_bf16(x, h0, c0)
    jax.block_until_ready((new_h16, new_c16))
    ref_h16, ref_c16 = _reference(x, h0, c0, w_in, b_in, w_rec, matmul_dtype=jnp.bfloat16)
    np.testing.assert_allclose(np.asarray(new_h16), np.asarray(ref_h16), rtol=2e-3, atol=2e-3)
    np.testing.assert_allclose(np.asarray(new_c16), np.asarray(ref_c16), rtol=2e-3, atol=2e-3)

    print("KERNEL_OK")
</pallas_src>

<mosaic_0001>
module attributes {stable_mosaic.version = 11 : i64} {
  func.func @_lstm_cell_kernel(%arg0: i32, %arg1: i32, %arg2: memref<8x16xf32, #tpu.memory_space<vmem>>, %arg3: memref<8x32xf32, #tpu.memory_space<vmem>>, %arg4: memref<8x128xf32, #tpu.memory_space<vmem>>, %arg5: memref<16x512xf32, #tpu.memory_space<vmem>>, %arg6: memref<32x512xf32, #tpu.memory_space<vmem>>, %arg7: memref<1x512xf32, #tpu.memory_space<vmem>>, %arg8: memref<8x128xf32, #tpu.memory_space<vmem>>, %arg9: memref<8x128xf32, #tpu.memory_space<vmem>>) attributes {dimension_semantics = [#tpu.dimension_semantics<parallel>, #tpu.dimension_semantics<parallel>], iteration_bounds = array<i64: 1, 1>, scalar_prefetch = 0 : i64, scratch_operands = 0 : i64, tpu.core_type = #tpu.core_type<tc>, window_params = [{transform_indices = @transform_0, window_bounds = array<i64: 8, 16>}, {transform_indices = @transform_1, window_bounds = array<i64: 8, 32>}, {transform_indices = @transform_2, window_bounds = array<i64: 8, 128>}, {transform_indices = @transform_3, window_bounds = array<i64: 16, 512>}, {transform_indices = @transform_4, window_bounds = array<i64: 32, 512>}, {transform_indices = @transform_5, window_bounds = array<i64: 1, 512>}, {transform_indices = @transform_6, window_bounds = array<i64: 8, 128>}, {transform_indices = @transform_7, window_bounds = array<i64: 8, 128>}]} {
    %c0 = arith.constant 0 : index
    %c0_0 = arith.constant 0 : index
    %0 = vector.load %arg2[%c0, %c0_0] : memref<8x16xf32, #tpu.memory_space<vmem>>, vector<8x16xf32>
    %c0_1 = arith.constant 0 : index
    %c0_2 = arith.constant 0 : index
    %1 = vector.load %arg5[%c0_1, %c0_2] : memref<16x512xf32, #tpu.memory_space<vmem>>, vector<16x512xf32>
    %cst = arith.constant dense<0.000000e+00> : vector<8x512xf32>
    %2 = tpu.matmul %0, %1, %cst {dimension_numbers = #tpu.dot_dimension_numbers<[1], [0], [0], [1], [0, 0, 1, 1], [], []>} : vector<8x16xf32>, vector<16x512xf32>, vector<8x512xf32> -> vector<8x512xf32>
    %c0_3 = arith.constant 0 : index
    %c0_4 = arith.constant 0 : index
    %3 = vector.load %arg3[%c0_3, %c0_4] : memref<8x32xf32, #tpu.memory_space<vmem>>, vector<8x32xf32>
    %c0_5 = arith.constant 0 : index
    %c0_6 = arith.constant 0 : index
    %4 = vector.load %arg6[%c0_5, %c0_6] : memref<32x512xf32, #tpu.memory_space<vmem>>, vector<32x512xf32>
    %cst_7 = arith.constant dense<0.000000e+00> : vector<8x512xf32>
    %5 = tpu.matmul %3, %4, %cst_7 {dimension_numbers = #tpu.dot_dimension_numbers<[1], [0], [0], [1], [0, 0, 1, 1], [], []>} : vector<8x32xf32>, vector<32x512xf32>, vector<8x512xf32> -> vector<8x512xf32>
    %6 = arith.addf %2, %5 : vector<8x512xf32>
    %c0_8 = arith.constant 0 : index
    %c0_9 = arith.constant 0 : index
    %7 = vector.load %arg7[%c0_8, %c0_9] : memref<1x512xf32, #tpu.memory_space<vmem>>, vector<1x512xf32>
    %8 = vector.broadcast %7 : vector<1x512xf32> to vector<8x512xf32>
    %9 = arith.addf %6, %8 : vector<8x512xf32>
    %c0_10 = arith.constant 0 : index
    %c0_11 = arith.constant 0 : index
    %10 = vector.load %arg4[%c0_10, %c0_11] : memref<8x128xf32, #tpu.memory_space<vmem>>, vector<8x128xf32>
    %11 = vector.extract_strided_slice %9 {offsets = [0, 0], sizes = [8, 128], strides = [1, 1]} : vector<8x512xf32> to vector<8x128xf32>
    %12 = math.tanh %11 : vector<8x128xf32>
    %13 = vector.extract_strided_slice %9 {offsets = [0, 128], sizes = [8, 128], strides = [1, 1]} : vector<8x512xf32> to vector<8x128xf32>
    %cst_12 = arith.constant 5.000000e-01 : f32
    %14 = vector.broadcast %cst_12 : f32 to vector<8x128xf32>
    %15 = arith.mulf %14, %13 : vector<8x128xf32>
    %16 = math.tanh %15 : vector<8x128xf32>
    %cst_13 = arith.constant 5.000000e-01 : f32
    %17 = vector.broadcast %cst_13 : f32 to vector<8x128xf32>
    %18 = arith.mulf %17, %16 : vector<8x128xf32>
    %cst_14 = arith.constant 5.000000e-01 : f32
    %19 = vector.broadcast %cst_14 : f32 to vector<8x128xf32>
    %20 = arith.addf %18, %19 : vector<8x128xf32>
    %21 = vector.extract_strided_slice %9 {offsets = [0, 256], sizes = [8, 128], strides = [1, 1]} : vector<8x512xf32> to vector<8x128xf32>
    %cst_15 = arith.constant 5.000000e-01 : f32
    %22 = vector.broadcast %cst_15 : f32 to vector<8x128xf32>
    %23 = arith.mulf %22, %21 : vector<8x128xf32>
    %24 = math.tanh %23 : vector<8x128xf32>
    %cst_16 = arith.constant 5.000000e-01 : f32
    %25 = vector.broadcast %cst_16 : f32 to vector<8x128xf32>
    %26 = arith.mulf %25, %24 : vector<8x128xf32>
    %cst_17 = arith.constant 5.000000e-01 : f32
    %27 = vector.broadcast %cst_17 : f32 to vector<8x128xf32>
    %28 = arith.addf %26, %27 : vector<8x128xf32>
    %29 = vector.extract_strided_slice %9 {offsets = [0, 384], sizes = [8, 128], strides = [1, 1]} : vector<8x512xf32> to vector<8x128xf32>
    %cst_18 = arith.constant 5.000000e-01 : f32
    %30 = vector.broadcast %cst_18 : f32 to vector<8x128xf32>
    %31 = arith.mulf %30, %29 : vector<8x128xf32>
    %32 = math.tanh %31 : vector<8x128xf32>
    %cst_19 = arith.constant 5.000000e-01 : f32
    %33 = vector.broadcast %cst_19 : f32 to vector<8x128xf32>
    %34 = arith.mulf %33, %32 : vector<8x128xf32>
    %cst_20 = arith.constant 5.000000e-01 : f32
    %35 = vector.broadcast %cst_20 : f32 to vector<8x128xf32>
    %36 = arith.addf %34, %35 : vector<8x128xf32>
    %37 = arith.mulf %10, %28 : vector<8x128xf32>
    %38 = arith.mulf %12, %20 : vector<8x128xf32>
    %39 = arith.addf %37, %38 : vector<8x128xf32>
    %40 = math.tanh %39 : vector<8x128xf32>
    %41 = arith.mulf %40, %36 : vector<8x128xf32>
    %c0_21 = arith.constant 0 : index
    %c0_22 = arith.constant 0 : index
    %42 = vector.load %arg8[%c0_21, %c0_22] : memref<8x128xf32, #tpu.memory_space<vmem>>, vector<8x128xf32>
    tpu.vector_store %arg8[%c0_21, %c0_22], %41 {strides = array<i32>} : memref<8x128xf32, #tpu.memory_space<vmem>>, vector<8x128xf32>,
    %c0_23 = arith.constant 0 : index
    %c0_24 = arith.constant 0 : index
    %43 = vector.load %arg9[%c0_23, %c0_24] : memref<8x128xf32, #tpu.memory_space<vmem>>, vector<8x128xf32>
    tpu.vector_store %arg9[%c0_23, %c0_24], %39 {strides = array<i32>} : memref<8x128xf32, #tpu.memory_space<vmem>>, vector<8x128xf32>,
    return
  }
  func.func @transform_0(%arg0: i32, %arg1: i32) -> (i32, i32) {
    %c0_i32 = arith.constant 0 : i32
    %c0_i32_0 = arith.constant 0 : i32
    return %arg1, %c0_i32 : i32, i32
  }
  func.func @transform_1(%arg0: i32, %arg1: i32) -> (i32, i32) {
    %c0_i32 = arith.constant 0 : i32
    %c0_i32_0 = arith.constant 0 : i32
    return %arg1, %c0_i32 : i32, i32
  }
  func.func @transform_2(%arg0: i32, %arg1: i32) -> (i32, i32) {
    %c0_i32 = arith.constant 0 : i32
    return %arg1, %arg0 : i32, i32
  }
  func.func @transform_3(%arg0: i32, %arg1: i32) -> (i32, i32) {
    %c0_i32 = arith.constant 0 : i32
    %c0_i32_0 = arith.constant 0 : i32
    return %c0_i32, %arg0 : i32, i32
  }
  func.func @transform_4(%arg0: i32, %arg1: i32) -> (i32, i32) {
    %c0_i32 = arith.constant 0 : i32
    %c0_i32_0 = arith.constant 0 : i32
    return %c0_i32, %arg0 : i32, i32
  }
  func.func @transform_5(%arg0: i32, %arg1: i32) -> (i32, i32) {
    %c0_i32 = arith.constant 0 : i32
    %c0_i32_0 = arith.constant 0 : i32
    return %c0_i32, %arg0 : i32, i32
  }
  func.func @transform_6(%arg0: i32, %arg1: i32) -> (i32, i32) {
    %c0_i32 = arith.constant 0 : i32
    return %arg1, %arg0 : i32, i32
  }
  func.func @transform_7(%arg0: i32, %arg1: i32) -> (i32, i32) {
    %c0_i32 = arith.constant 0 : i32
    return %arg1, %arg0 : i32, i32
  }
}

</mosaic_0001>

<bundles_post_ra>
// kernel: lstm_cell.1
= control target key start
LH: loop header
LB: loop body
LE: loop exit
PB: predicated region body
PF: predicated region fallthrough
CT: control target
= control target key end

     0   :  { %13 = vsyncpa [#allocation3], 0  ;;  %s702_s0 = inlined_call_operand.vmem [shape: f32[8,16], index: 0, kind: input, shape index: {}]   ;;  %s703_s1 = inlined_call_operand.vmem [shape: f32[8,32], index: 1, kind: input, shape index: {}]   ;;  %s704_s2 = inlined_call_operand.vmem [shape: f32[8,128], index: 2, kind: input, shape index: {}]   ;;  %s705_s3 = inlined_call_operand.hbm [shape: f32[16,512], index: 3, kind: input, shape index: {}]   ;;  %s706_s4 = inlined_call_operand.hbm [shape: f32[32,512], index: 4, kind: input, shape index: {}]   ;;  %s707_s5 = inlined_call_operand.vmem [shape: f32[1,512], index: 5, kind: input, shape index: {}]   ;;  %s708_s6 = inlined_call_operand.hbm [shape: f32[8,128], index: 6, kind: output, shape index: {0}]   ;;  %s709_s7 = inlined_call_operand.hbm [shape: f32[8,128], index: 7, kind: output, shape index: {1}]  }
   0x1   :  { %14 = vsyncpa [#allocation6], 0 }
   0x2   :  { %15 = vsyncpa [#allocation4], 0 }
   0x3   :  { %16 = vsyncpa [#allocation9], 0  ;;  %s595_s24 = smov [#allocation2]   ;;  %s499_s28 = scalar_lea.hbm %s705_s3, 1024 }
   0x4   :  { %s28_s25 = sshll.u32 %s595_s24, 4  ;;  %p500_p0 = scmp.ne.s32.totalorder %s705_s3, %s499_s28  ;;  %s29_s25 = int_to_ptr.vmem [resolvable:$true] %s28_s25 }
   0x5   :  { %p503_p1 = scmp.lt.u32.totalorder %s499_s28, %s705_s3 }
   0x7   :  { %p505_p2 = pnand %p503_p1, %p500_p0 }
   0x9   :  { %508 = shalt.err (!%p505_p2)
}
   0xa   :  { %s509_s10 = scalar_lea.vmem %s29_s25, 1024  ;;  %p514_p4 = scmp.lt.s32.totalorder %s29_s25, %s29_s25 }
   0xb   :  { %p510_p3 = scmp.ne.s32.totalorder %s29_s25, %s509_s10  ;;  %p515_p5 = scmp.lt.s32.totalorder %s509_s10, %s509_s10 }
   0xd   :  { %p516_p6 = por %p515_p5, %p514_p4 }
   0xf   :  { %p517_p7 = pnand %p516_p6, %p510_p3 }
  0x11   :  { %520 = shalt.err (!%p517_p7)
}
  0x12   :  { %s596_s11 = smov 512   ;;  %s597_s12 = smov 32  }
  0x13   :  { %34 = dma.hbm_to_vmem [thread:$0]  %s705_s3, 1024, %s29_s25, [#allocation3], %s596_s11, %s596_s11, %s597_s12  }
  0x14   :  { %s598_s15 = smov [#allocation5]   ;;  %s521_s19 = scalar_lea.hbm %s706_s4, 2048 }
  0x15   :  { %s40_s16 = sshll.u32 %s598_s15, 4  ;;  %p522_p8 = scmp.ne.s32.totalorder %s706_s4, %s521_s19  ;;  %s41_s16 = int_to_ptr.vmem [resolvable:$true] %s40_s16 }
  0x16   :  { %p525_p9 = scmp.lt.u32.totalorder %s521_s19, %s706_s4 }
  0x18   :  { %p527_p10 = pnand %p525_p9, %p522_p8 }
  0x1a   :  { %530 = shalt.err (!%p527_p10)
}
  0x1b   :  { %s531_s24 = scalar_lea.vmem %s41_s16, 2048  ;;  %p536_p12 = scmp.lt.s32.totalorder %s41_s16, %s41_s16 }
  0x1c   :  { %p532_p11 = scmp.ne.s32.totalorder %s41_s16, %s531_s24  ;;  %p537_p13 = scmp.lt.s32.totalorder %s531_s24, %s531_s24 }
  0x1e   :  { %p538_p0 = por %p537_p13, %p536_p12 }
  0x20   :  { %p539_p1 = pnand %p538_p0, %p532_p11 }
  0x22   :  { %542 = shalt.err (!%p539_p1)
}
  0x23   :  { %46 = dma.hbm_to_vmem [thread:$0]  %s706_s4, 2048, %s41_s16, [#allocation6], %s596_s11, %s596_s11, %s597_s12  }
  0x24   :  { %587 = dma.done.wait [#allocation3], 1024  }
  0x25   :  { %588 = vsyncadd [#allocation3], 4294966272 }
  0x26   :  { %589 = dma.done.wait [#allocation6], 2048  }
  0x27   :  { %590 = vsyncadd [#allocation6], 4294965248  ;;  %v599_v0 = vmov 0.0   ;;  %v66_v1 = vld [vmem:[#allocation5 + $0x8] sm:$0xff]  ;;  %v68_v3 = vld [vmem:[#allocation5 + $0x18] sm:$0xff]  ;;  %vm81_vm0 = vcmask 261120   ;;  %v375_v39 = vlaneseq }
  0x28   :  { %149 = vmatprep.mubr.f32.mxu0 %v599_v0  ;;  %220 = vmatprep.mubr.f32.mxu1 %v599_v0  ;;  %v70_v2 = vld [vmem:[#allocation5 + $0x28] sm:$0xff]  ;;  %v72_v5 = vld [vmem:[#allocation5 + $0x38] sm:$0xff]  ;;  %v65_v6 = vld [vmem:[#allocation5] sm:$0xff]  ;;  %vm227_vm1 = vcmask 130048   ;;  %s600_s30 = smov [#allocation8]  }
  0x29   :  { %v454_v4 = vpack.c.bf16 %v70_v2, %v66_v1  ;;  %v69_v7 = vld [vmem:[#allocation5 + $0x20] sm:$0xff]  ;;  %v462_v8 = vpack.c.bf16 %v72_v5, %v68_v3  ;;  %v67_v10 = vld [vmem:[#allocation5 + $0x10] sm:$0xff]  ;;  %v74_v12 = vld [vmem:[#allocation5 + $0x48] sm:$0xff]  ;;  %v376_v40 = vshrl.u32 %v375_v39, 7  ;;  %s436_s8 = sshll.u32 %s600_s30, 4  ;;  %s437_s8 = int_to_ptr.vmem [resolvable:$true] %s436_s8 }
  0x2a   :  { %v456_v9 = vpack.c.bf16 %v69_v7, %v65_v6  ;;  %v71_v11 = vld [vmem:[#allocation5 + $0x30] sm:$0xff]  ;;  %v78_v14 = vld [vmem:[#allocation5 + $0x68] sm:$0xff]  ;;  %v76_v15 = vld [vmem:[#allocation5 + $0x58] sm:$0xff]  ;;  %s543_s9 = scalar_lea.vmem %s437_s8, 128  ;;  %p548_p3 = scmp.lt.s32.totalorder %s437_s8, %s437_s8 }
  0x2b   :  { %455 = vmatprep.subr.bf16.mxu0 %v454_v4  ;;  %v464_v13 = vpack.c.bf16 %v71_v11, %v67_v10  ;;  %v80_v16 = vld [vmem:[#allocation5 + $0x78] sm:$0xff]  ;;  %463 = vmatprep.subr.bf16.mxu1 %v462_v8  ;;  %v458_v17 = vpack.c.bf16 %v78_v14, %v74_v12  ;;  %v73_v19 = vld [vmem:[#allocation5 + $0x40] sm:$0xff]  ;;  %v75_v21 = vld [vmem:[#allocation5 + $0x50] sm:$0xff]  ;;  %v385_v41 = vsub.s32 2, %v376_v40  ;;  %v381_v42 = vsub.s32 1, %v376_v40  ;;  %p544_p2 = scmp.ne.s32.totalorder %s437_s8, %s543_s9  ;;  %p549_p4 = scmp.lt.s32.totalorder %s543_s9, %s543_s9 }
  0x2c   :  { %457 = vmatpush1.bf16.msra.mxu0 %v456_v9  ;;  %v466_v18 = vpack.c.bf16 %v80_v16, %v76_v15  ;;  %v77_v20 = vld [vmem:[#allocation5 + $0x60] sm:$0xff]  ;;  %v79_v23 = vld [vmem:[#allocation5 + $0x70] sm:$0xff]  ;;  %v57_v24 = vld [vmem:[#allocation2 + $0x8] sm:$0xff]  ;;  %v377_v46 = vsub.s32 0, %v376_v40  ;;  %v389_v53 = vsub.s32 3, %v376_v40 }
  0x2d   :  { %465 = vmatpush1.bf16.msra.mxu1 %v464_v13  ;;  %v460_v22 = vpack.c.bf16 %v77_v20, %v73_v19  ;;  %459 = vmatprep.subr.bf16.mxu0 %v458_v17  ;;  %v468_v25 = vpack.c.bf16 %v79_v23, %v75_v21  ;;  %v61_v26 = vld [vmem:[#allocation2 + $0x28] sm:$0xff]  ;;  %v56_v27 = vld [vmem:[#allocation2] sm:$0xff]  ;;  %v59_v30 = vld [vmem:[#allocation2 + $0x18] sm:$0xff]  ;;  %p550_p5 = por %p549_p4, %p548_p3 }
  0x2e   :  { %467 = vmatprep.subr.bf16.mxu1 %v466_v18  ;;  %v60_v28 = vld [vmem:[#allocation2 + $0x20] sm:$0xff]  ;;  %v470_v29 = vpack.c.bf16 %v61_v26, %v57_v24  ;;  %v63_v31 = vld [vmem:[#allocation2 + $0x38] sm:$0xff]  ;;  %v58_v32 = vld [vmem:[#allocation2 + $0x10] sm:$0xff] }
  0x2f   :  { %v64_v33 = vld [vmem:[%s703_s1] sm:$0xff]  ;;  %v472_v34 = vpack.c.bf16 %v60_v28, %v56_v27  ;;  %v474_v35 = vpack.c.bf16 %v63_v31, %v59_v30  ;;  %v62_v36 = vld [vmem:[#allocation2 + $0x30] sm:$0xff]  ;;  %p551_p6 = pnand %p550_p5, %p544_p2 }
  0x30   :  { %461 = vmatpush1.bf16.msra.mxu0 %v460_v22  ;;  %v476_v37 = vpack.c.bf16 %v62_v36, %v58_v32  ;;  %v55_v38 = vld [vmem:[%s702_s0] sm:$0xff] }
  0x31   :  { %469 = vmatpush1.bf16.msra.mxu1 %v468_v25  ;;  %471 = vmatprep.subr.bf16.mxu0 %v470_v29  ;;  %v373_v43 = vld [vmem:[%s707_s5] sm:$0xf] }
  0x32   :  { %475 = vmatprep.subr.bf16.mxu1 %v474_v35  ;;  %v386_v44 = vrot.slane %v373_v43, %v385_v41  ;;  %v382_v45 = vrot.slane %v373_v43, %v381_v42  ;;  %v378_v54 = vrot.slane %v373_v43, %v377_v46  ;;  %v390_v57 = vrot.slane %v373_v43, %v389_v53 }
  0x33   :  { %450 = vmatmul.mubr.msk.f32.vlgmr.msra.gmra.mrb[0].mxu0 %vm81_vm0, %v64_v33 }
  0x34   :  { %451 = vmatmul.mubr.msk.f32.vlgmr.msra.gmra.mrb[0].mxu1 %vm81_vm0, %v64_v33  ;;  %473 = vmatpush1.bf16.msra.mxu0 %v472_v34 }
  0x35   :  { %477 = vmatpush1.bf16.msra.mxu1 %v476_v37  ;;  %295 = vmatprep.mubr.f32.mxu0 %v599_v0 }
  0x36   :  { %366 = vmatprep.mubr.f32.mxu1 %v599_v0  ;;  %v399_v0 = vld [vmem:[%s704_s2] sm:$0xff] }
  0x3b   :  { %452 = vmatmul.mubr.msk.f32.vlgmr.msra.gmra.mrb[0].mxu0 %vm227_vm1, %v55_v38 }
  0x3c   :  { %453 = vmatmul.mubr.msk.f32.vlgmr.msra.gmra.mrb[0].mxu1 %vm227_vm1, %v55_v38 }
 0x10e   :  { %v297_v47 = vpop.f32.mrb[0].mxu0 }
 0x10f   :  { %v368_v48 = vpop.f32.mrb[0].mxu1  ;;  %v299_v49 = vpop.f32.mrb[1].mxu0  ;;  %v395_v58 = vadd.f32 %v378_v54, %v297_v47 }
 0x110   :  { %v397_v50 = vadd.f32 %v386_v44, %v368_v48  ;;  %v396_v51 = vadd.f32 %v382_v45, %v299_v49  ;;  %v370_v52 = vpop.f32.mrb[1].mxu1 }
 0x111   :  { %v398_v59 = vadd.f32 %v390_v57, %v370_v52 }
 0x112   :  { %v405_v55 = vmul.f32 0.5, %v397_v50  ;;  %v401_v56 = vmul.f32 0.5, %v396_v51 }
 0x113   :  { %v409_v60 = vmul.f32 0.5, %v398_v59 }
 0x114   :  { %489 = vtanh.f32 %v405_v55 }
 0x115   :  { %491 = vtanh.f32 %v401_v56 }
 0x116   :  { %493 = vtanh.f32 %v395_v58 }
 0x117   :  { %495 = vtanh.f32 %v409_v60 }
 0x11e   :  { %v490_v61 = vpop.eup %489 }
 0x11f   :  { %v492_v62 = vpop.eup %491  ;;  %v407_v63 = vmul.f32 0.5, %v490_v61 }
 0x120   :  { %v403_v1 = vmul.f32 0.5, %v492_v62  ;;  %v494_v4 = vpop.eup %493 }
 0x121   :  { %v408_v2 = vadd.f32 0.5, %v407_v63 }
 0x122   :  { %v404_v3 = vadd.f32 0.5, %v403_v1 }
 0x123   :  { %v413_v5 = vmul.f32 %v408_v2, %v399_v0 }
 0x124   :  { %v414_v6 = vmul.f32 %v494_v4, %v404_v3 }
 0x126   :  { %v415_v7 = vadd.f32 %v414_v6, %v413_v5 }
 0x128   :  { %497 = vtanh.f32 %v415_v7  ;;  %419 = vst [vmem:[#allocation8] sm:$0xff] %v415_v7 }
 0x129   :  { %554 = shalt.err (!%p551_p6)
}
 0x12a   :  { %s555_s11 = scalar_lea.hbm %s709_s7, 128 }
 0x12b   :  { %p556_p7 = scmp.ne.s32.totalorder %s709_s7, %s555_s11  ;;  %p559_p8 = scmp.lt.u32.totalorder %s555_s11, %s709_s7 }
 0x12d   :  { %p561_p9 = pnand %p559_p8, %p556_p7 }
 0x12f   :  { %564 = shalt.err (!%p561_p9)
}
 0x130   :  { %439 = dma.vmem_to_hbm [thread:$0]  %s437_s8, 128, %s709_s7, [#allocation9]   ;;  %v496_v8 = vpop.eup %495 }
 0x131   :  { %v411_v9 = vmul.f32 0.5, %v496_v8  ;;  %s601_s18 = smov [#allocation7]  }
 0x132   :  { %s426_s19 = sshll.u32 %s601_s18, 4  ;;  %v498_v11 = vpop.eup %497  ;;  %s427_s19 = int_to_ptr.vmem [resolvable:$true] %s426_s19 }
 0x133   :  { %v412_v10 = vadd.f32 0.5, %v411_v9  ;;  %s565_s20 = scalar_lea.vmem %s427_s19, 128  ;;  %p570_p11 = scmp.lt.s32.totalorder %s427_s19, %s427_s19 }
 0x134   :  { %p566_p10 = scmp.ne.s32.totalorder %s427_s19, %s565_s20  ;;  %p571_p12 = scmp.lt.s32.totalorder %s565_s20, %s565_s20 }
 0x135   :  { %v417_v12 = vmul.f32 %v498_v11, %v412_v10 }
 0x136   :  { %p572_p13 = por %p571_p12, %p570_p11 }
 0x137   :  { %418 = vst [vmem:[#allocation7] sm:$0xff] %v417_v12 }
 0x138   :  { %p573_p0 = pnand %p572_p13, %p566_p10 }
 0x13a   :  { %576 = shalt.err (!%p573_p0)
}
 0x13b   :  { %s577_s7 = scalar_lea.hbm %s708_s6, 128 }
 0x13c   :  { %p578_p1 = scmp.ne.s32.totalorder %s708_s6, %s577_s7  ;;  %p581_p2 = scmp.lt.u32.totalorder %s577_s7, %s708_s6 }
 0x13e   :  { %p583_p3 = pnand %p581_p2, %p578_p1 }
 0x140   :  { %586 = shalt.err (!%p583_p3)
}
 0x141   :  { %429 = dma.vmem_to_hbm [thread:$0]  %s427_s19, 128, %s708_s6, [#allocation4]  }
 0x142   :  { %591 = dma.done.wait [#allocation4], 128  }
 0x143   :  { %592 = vsyncadd [#allocation4], 4294967168 }
 0x144   :  { %593 = dma.done.wait [#allocation9], 128  }
 0x145   :  { %594 = vsyncadd [#allocation9], 4294967168 }
 0x146   :  { %446 = vsyncpa [#allocation3], 1 }
 0x147   :  { %447 = vsyncpa [#allocation6], 1 }
 0x148   :  { %448 = vsyncpa [#allocation4], 1 }
 0x149   :  { %449 = vsyncpa [#allocation9], 1 }

</bundles_post_ra>
